<compile_context>
chip_gen: v7x
topology: tpu7x:2x2x1
jax: 0.10.0
libtpu: 0.0.40
codegen_flags: <defaults>
</compile_context>

<pallas_src>
import jax
import jax.numpy as jnp
from jax.experimental import pallas as pl
from jax.experimental.pallas import tpu as pltpu


def _round_up(x, m):
    return ((x + m - 1) // m) * m


def _cdiv(a, b):
    return -(-a // b)


def _make_segmenter_kernel(nb):
    """Kernel processing `nb` images per grid step (nb is static)."""

    def kernel(x_ref, we_t_ref, be_ref, wd_t_ref, bd_ref, o_ref):
        # Load (tiny) weights/biases once per grid step.
        we_t = we_t_ref[...]          # (C_hid, C_in)  f32
        be = be_ref[...]              # (C_hid, 1)     f32
        wd_t = wd_t_ref[...]          # (C_out, C_hid) f32
        bd = bd_ref[...]              # (C_out, 1)     f32
        for i in range(nb):           # static unroll (nb is small)
            # x block: (C_in, pix_tile), pixels on lanes; bf16 stream -> f32 compute.
            x = x_ref[i].astype(jnp.float32)
            # encoder 1x1 conv: h = relu(W_e^T @ x + b_e)   -> (C_hid, pix_tile)
            h = jnp.dot(we_t, x, preferred_element_type=jnp.float32)
            h = jnp.maximum(h + be, 0.0)
            # decoder 1x1 conv: o = W_d^T @ h + b_d          -> (C_out, pix_tile)
            o = jnp.dot(wd_t, h, preferred_element_type=jnp.float32)
            o_ref[i] = (o + bd).astype(o_ref.dtype)

    return kernel


def segmenter_forward(x_nchw, w_enc, b_enc, w_dec, b_dec, *,
                      stream_dtype=jnp.bfloat16,
                      vmem_tile_budget_bytes=20 * 1024 * 1024,
                      max_pix_tile=65536):
    """x_nchw: (N, C_in, H, W).  Returns (N, n_classes, H, W) float32."""
    N, C_in, H, W = x_nchw.shape
    C_hid = w_enc.shape[1]
    C_out = w_dec.shape[1]
    hw = H * W

    x_bytes = jnp.dtype(stream_dtype).itemsize

    # ---- Tile selection from a VMEM byte budget -----------------------------
    # Per pixel per image: double-buffered x + double-buffered out + f32 hidden.
    per_pix_bytes = 2 * C_in * x_bytes + 2 * C_out * 4 + C_hid * 4
    max_pix_per_step = max(128, vmem_tile_budget_bytes // per_pix_bytes)
    t_cap = max(128, (min(max_pix_per_step, max_pix_tile) // 128) * 128)

    if hw <= min(max_pix_per_step, max_pix_tile):
        # Whole image fits in one tile: full-extent block (always a legal shape).
        pix_tile = hw
        n_pix_blocks = 1
    else:
        # Balance block count to minimize the ragged tail, keep lane-dense tiles.
        n_pix_blocks = _cdiv(hw, t_cap)
        pix_tile = _round_up(_cdiv(hw, n_pix_blocks), 128)
        n_pix_blocks = _cdiv(hw, pix_tile)

    # ---- Batch blocking for small images ------------------------------------
    # Pack several images per step when one tile covers a whole image, but keep
    # at least 2 grid steps so both v7x TensorCores get work.
    nb = 1
    if n_pix_blocks == 1 and N > 1:
        for d in range(2, N + 1):
            if N % d == 0 and d * hw <= max_pix_per_step and (N // d) >= 2:
                nb = d

    # Single huge image: split the pixel axis in two so a "parallel" axis has
    # >= 2 steps (v7x megacore); on v5e/v6e this is harmless.
    if (N // nb) * n_pix_blocks < 2 and hw >= 256:
        pix_tile = _round_up(_cdiv(hw, 2), 128)
        n_pix_blocks = _cdiv(hw, pix_tile)

    # ---- Host-side prep (free reshapes only, no big-tensor transpose/pad) ----
    # NCHW is already channel-major per image -> (N, C_in, H*W) is a free view.
    x3 = x_nchw.reshape(N, C_in, hw)
    if x3.dtype != stream_dtype:
        # TODO(synk): in a real pipeline the producer should emit `stream_dtype`
        # directly so this cast does not cost an extra HBM round trip.
        x3 = x3.astype(stream_dtype)

    we_t = jnp.transpose(w_enc).astype(jnp.float32)   # (C_hid, C_in)
    wd_t = jnp.transpose(w_dec).astype(jnp.float32)   # (C_out, C_hid)
    be_c = b_enc.reshape(C_hid, 1).astype(jnp.float32)
    bd_c = b_dec.reshape(C_out, 1).astype(jnp.float32)

    grid = (N // nb, n_pix_blocks)

    flops = 2 * N * hw * (C_in * C_hid + C_hid * C_out)
    bytes_accessed = (N * hw * (C_in * x_bytes + C_out * 4)
                      + (C_in * C_hid + C_hid * C_out + C_hid + C_out) * 4)
    cost = pl.CostEstimate(flops=flops, transcendentals=0,
                           bytes_accessed=bytes_accessed)

    out3 = pl.pallas_call(
        _make_segmenter_kernel(nb),
        out_shape=jax.ShapeDtypeStruct((N, C_out, hw), jnp.float32),
        grid_spec=pltpu.PrefetchScalarGridSpec(
            num_scalar_prefetch=0,
            grid=grid,
            in_specs=[
                # x tile: (nb images, all channels, pixel tile on lanes).
                # Ragged last pixel block is masked by Pallas (no pad needed).
                pl.BlockSpec((nb, C_in, pix_tile), lambda b, p: (b, 0, p)),
                # Weights / biases: constant index_map -> resident in VMEM.
                pl.BlockSpec((C_hid, C_in), lambda b, p: (0, 0)),
                pl.BlockSpec((C_hid, 1), lambda b, p: (0, 0)),
                pl.BlockSpec((C_out, C_hid), lambda b, p: (0, 0)),
                pl.BlockSpec((C_out, 1), lambda b, p: (0, 0)),
            ],
            out_specs=pl.BlockSpec((nb, C_out, pix_tile), lambda b, p: (b, 0, p)),
        ),
        compiler_params=pltpu.CompilerParams(
            dimension_semantics=("parallel", "parallel"),
            vmem_limit_bytes=48 * 1024 * 1024),
        cost_estimate=cost,
    )(x3, we_t, be_c, wd_t, bd_c)

    # Restore spatial dims with a free reshape (no transpose, no slice).
    return out3.reshape(N, C_out, H, W)


if __name__ == "__main__":
    # Small deterministic problem: batch=2, C_in=4, 16x16 spatial, hidden=32,
    # n_classes=8.
    key = jax.random.PRNGKey(0)
    k_x, k_we, k_be, k_wd, k_bd = jax.random.split(key, 5)

    N, C_in, H, W = 2, 4, 16, 16
    C_hid, C_out = 32, 8

    x = jax.random.normal(k_x, (N, C_in, H, W), dtype=jnp.float32)
    w_enc = jax.random.normal(k_we, (C_in, C_hid), dtype=jnp.float32) * 0.1
    b_enc = jax.random.normal(k_be, (C_hid,), dtype=jnp.float32) * 0.1
    w_dec = jax.random.normal(k_wd, (C_hid, C_out), dtype=jnp.float32) * 0.1
    b_dec = jax.random.normal(k_bd, (C_out,), dtype=jnp.float32) * 0.1

    out = jax.jit(segmenter_forward)(x, w_enc, b_enc, w_dec, b_dec)
    out = jax.block_until_ready(out)

    # Pure-JAX references of the same encoder/decoder semantics.
    def ref(xv):
        xf = jnp.transpose(xv, (0, 2, 3, 1)).reshape(-1, C_in)
        h = jnp.maximum(xf @ w_enc + b_enc, 0.0)
        o = (h @ w_dec + b_dec).reshape(N, H, W, C_out)
        return jnp.transpose(o, (0, 3, 1, 2))

    # (a) matched check: same bf16-quantized input stream as the kernel, f32 math.
    x_bf = x.astype(jnp.bfloat16).astype(jnp.float32)
    ref_matched = ref(x_bf)
    # (b) sanity check vs. full-f32 reference (bf16 activation-stream tolerance).
    ref_f32 = ref(x)

    assert out.shape == (N, C_out, H, W)
    assert jnp.allclose(out, ref_matched, atol=1e-3, rtol=1e-3)
    assert jnp.allclose(out, ref_f32, atol=5e-2, rtol=5e-2)

    print("KERNEL_OK")
</pallas_src>

<mosaic_0001>
module attributes {stable_mosaic.version = 11 : i64} {
  func.func @kernel(%arg0: i32, %arg1: i32, %arg2: memref<1x4x256xbf16, #tpu.memory_space<vmem>>, %arg3: memref<32x4xf32, #tpu.memory_space<vmem>>, %arg4: memref<32x1xf32, #tpu.memory_space<vmem>>, %arg5: memref<8x32xf32, #tpu.memory_space<vmem>>, %arg6: memref<8x1xf32, #tpu.memory_space<vmem>>, %arg7: memref<1x8x256xf32, #tpu.memory_space<vmem>>) attributes {dimension_semantics = [#tpu.dimension_semantics<parallel>, #tpu.dimension_semantics<parallel>], iteration_bounds = array<i64: 2, 1>, scalar_prefetch = 0 : i64, scratch_operands = 0 : i64, tpu.core_type = #tpu.core_type<tc>, window_params = [{transform_indices = @transform_0, window_bounds = array<i64: 1, 4, 256>}, {pipeline_mode = #tpu.pipeline_mode<synchronous>, transform_indices = @transform_1, window_bounds = array<i64: 32, 4>}, {pipeline_mode = #tpu.pipeline_mode<synchronous>, transform_indices = @transform_2, window_bounds = array<i64: 32, 1>}, {pipeline_mode = #tpu.pipeline_mode<synchronous>, transform_indices = @transform_3, window_bounds = array<i64: 8, 32>}, {pipeline_mode = #tpu.pipeline_mode<synchronous>, transform_indices = @transform_4, window_bounds = array<i64: 8, 1>}, {transform_indices = @transform_5, window_bounds = array<i64: 1, 8, 256>}]} {
    %c0 = arith.constant 0 : index
    %c0_0 = arith.constant 0 : index
    %0 = vector.load %arg3[%c0, %c0_0] : memref<32x4xf32, #tpu.memory_space<vmem>>, vector<32x4xf32>
    %c0_1 = arith.constant 0 : index
    %c0_2 = arith.constant 0 : index
    %1 = vector.load %arg4[%c0_1, %c0_2] : memref<32x1xf32, #tpu.memory_space<vmem>>, vector<32x1xf32>
    %c0_3 = arith.constant 0 : index
    %c0_4 = arith.constant 0 : index
    %2 = vector.load %arg5[%c0_3, %c0_4] : memref<8x32xf32, #tpu.memory_space<vmem>>, vector<8x32xf32>
    %c0_5 = arith.constant 0 : index
    %c0_6 = arith.constant 0 : index
    %3 = vector.load %arg6[%c0_5, %c0_6] : memref<8x1xf32, #tpu.memory_space<vmem>>, vector<8x1xf32>
    %c0_7 = arith.constant 0 : index
    %c0_8 = arith.constant 0 : index
    %c0_9 = arith.constant 0 : index
    %4 = vector.load %arg2[%c0_7, %c0_8, %c0_9] : memref<1x4x256xbf16, #tpu.memory_space<vmem>>, vector<1x4x256xbf16>
    %5 = vector.shape_cast %4 : vector<1x4x256xbf16> to vector<4x256xbf16>
    %6 = arith.extf %5 : vector<4x256xbf16> to vector<4x256xf32>
    %cst = arith.constant dense<0.000000e+00> : vector<32x256xf32>
    %7 = tpu.matmul %0, %6, %cst {dimension_numbers = #tpu.dot_dimension_numbers<[1], [0], [0], [1], [0, 0, 1, 1], [], []>} : vector<32x4xf32>, vector<4x256xf32>, vector<32x256xf32> -> vector<32x256xf32>
    %8 = vector.broadcast %1 : vector<32x1xf32> to vector<32x256xf32>
    %9 = arith.addf %7, %8 : vector<32x256xf32>
    %cst_10 = arith.constant 0.000000e+00 : f32
    %10 = vector.broadcast %cst_10 : f32 to vector<32x256xf32>
    %11 = arith.maximumf %9, %10 : vector<32x256xf32>
    %cst_11 = arith.constant dense<0.000000e+00> : vector<8x256xf32>
    %12 = tpu.matmul %2, %11, %cst_11 {dimension_numbers = #tpu.dot_dimension_numbers<[1], [0], [0], [1], [0, 0, 1, 1], [], []>} : vector<8x32xf32>, vector<32x256xf32>, vector<8x256xf32> -> vector<8x256xf32>
    %13 = vector.broadcast %3 : vector<8x1xf32> to vector<8x256xf32>
    %14 = arith.addf %12, %13 : vector<8x256xf32>
    %c0_12 = arith.constant 0 : index
    %c0_13 = arith.constant 0 : index
    %c0_14 = arith.constant 0 : index
    %15 = vector.load %arg7[%c0_12, %c0_13, %c0_14] : memref<1x8x256xf32, #tpu.memory_space<vmem>>, vector<1x8x256xf32>
    %16 = vector.shape_cast %15 : vector<1x8x256xf32> to vector<8x256xf32>
    %17 = vector.shape_cast %14 : vector<8x256xf32> to vector<1x8x256xf32>
    tpu.vector_store %arg7[%c0_12, %c0_13, %c0_14], %17 {strides = array<i32>} : memref<1x8x256xf32, #tpu.memory_space<vmem>>, vector<1x8x256xf32>,
    return
  }
  func.func @transform_0(%arg0: i32, %arg1: i32) -> (i32, i32, i32) {
    %c0_i32 = arith.constant 0 : i32
    %c0_i32_0 = arith.constant 0 : i32
    return %arg0, %c0_i32, %arg1 : i32, i32, i32
  }
  func.func @transform_1(%arg0: i32, %arg1: i32) -> (i32, i32) {
    %c0_i32 = arith.constant 0 : i32
    %c0_i32_0 = arith.constant 0 : i32
    %c0_i32_1 = arith.constant 0 : i32
    return %c0_i32, %c0_i32_0 : i32, i32
  }
  func.func @transform_2(%arg0: i32, %arg1: i32) -> (i32, i32) {
    %c0_i32 = arith.constant 0 : i32
    %c0_i32_0 = arith.constant 0 : i32
    %c0_i32_1 = arith.constant 0 : i32
    return %c0_i32, %c0_i32_0 : i32, i32
  }
  func.func @transform_3(%arg0: i32, %arg1: i32) -> (i32, i32) {
    %c0_i32 = arith.constant 0 : i32
    %c0_i32_0 = arith.constant 0 : i32
    %c0_i32_1 = arith.constant 0 : i32
    return %c0_i32, %c0_i32_0 : i32, i32
  }
  func.func @transform_4(%arg0: i32, %arg1: i32) -> (i32, i32) {
    %c0_i32 = arith.constant 0 : i32
    %c0_i32_0 = arith.constant 0 : i32
    %c0_i32_1 = arith.constant 0 : i32
    return %c0_i32, %c0_i32_0 : i32, i32
  }
  func.func @transform_5(%arg0: i32, %arg1: i32) -> (i32, i32, i32) {
    %c0_i32 = arith.constant 0 : i32
    %c0_i32_0 = arith.constant 0 : i32
    return %arg0, %c0_i32, %arg1 : i32, i32, i32
  }
}

</mosaic_0001>

<bundles_post_ra>
// kernel: segmenter_forward.1
= control target key start
LH: loop header
LB: loop body
LE: loop exit
PB: predicated region body
PF: predicated region fallthrough
CT: control target
= control target key end

     0   :  { %s694_s18 = smov 0   ;;  %s696_s19 = smov 0   ;;  %s761_s0 = inlined_call_operand.vmem [shape: bf16[2,4,256], index: 0, kind: input, shape index: {}]   ;;  %s762_s1 = inlined_call_operand.vmem [shape: f32[32,4], index: 1, kind: input, shape index: {}]   ;;  %s763_s2 = inlined_call_operand.vmem [shape: f32[32,1], index: 2, kind: input, shape index: {}]   ;;  %s764_s3 = inlined_call_operand.vmem [shape: f32[8,32], index: 3, kind: input, shape index: {}]   ;;  %s765_s4 = inlined_call_operand.vmem [shape: f32[8,1], index: 4, kind: input, shape index: {}]   ;;  %s766_s5 = inlined_call_operand.vmem [shape: f32[2,8,256], index: 5, kind: output, shape index: {}]  }
   0x1   :  { %s698_s20 = smov 0  }
   0x2 LB: > { %s27_s21 = sadd.s32 1, %s656_s19  ;;  %p586_p0 = scmp.ge.s32.totalorder %s660_s20, 1  ;;  %s660_s20 = sphi %s698_s20, %s15_s20   ;;  %s656_s19 = sphi %s696_s19, %s768_s19   ;;  %s652_s18 = sphi %s694_s18, %s767_s18  }
   0x3   : > { %p29_p1 = scmp.ge.s32.totalorder %s27_s21, 2  ;;  %p208_p2 = scmp.lt.s32.totalorder %s660_s20, 3 }
   0x5   : > { %s770_s21 = smov (%p29_p1, %s27_s21), 0  ;;  %p209_p3 = pnand %p586_p0, %p208_p2 }
   0x6   : > { %p245_p4 = scmp.lt.s32.totalorder (!%p209_p3), %s652_s18, 1  ;;  %v662_v0 = vmov (!%p209_p3), 0.0   ;;  %v268_v1 = vld [vmem:[%s763_s2] sm:$0xff] (!%p209_p3)  ;;  %v663_v2 = vmov (!%p209_p3), 0   ;;  %v270_v3 = vld [vmem:[%s763_s2 + $0x10] sm:$0xff] (!%p209_p3)  ;;  %v269_v4 = vld [vmem:[%s763_s2 + $0x8] sm:$0xff] (!%p209_p3) }
   0x7   : > { %212 = sbr.rel (%p209_p3) target bundleno = 475 (0x1db), region = 40  ;;  %380 = vmatprep.mubr.f32.mxu0 (!%p209_p3), %v662_v0  ;;  %486 = vmatprep.mubr.f32.mxu1 (!%p209_p3), %v662_v0  ;;  %v271_v5 = vld [vmem:[%s763_s2 + $0x18] sm:$0xff] (!%p209_p3)  ;;  %vm311_vm0 = vcmask (!%p209_p3), 1043456   ;;  %v273_v8 = vld [vmem:[%s765_s4] sm:$0xff] (!%p209_p3)  ;;  %vm298_vm1 = vcmask (!%p209_p3), 31744   ;;  %v265_v11 = vld [vmem:[%s762_s1 + $0x8] sm:$0xff] (!%p209_p3) }
   0x8   : > { %636 = vset.pattern.permute.xlu0 (!%p209_p3), %v663_v2  ;;  %637 = vset.pattern.permute.xlu1 (!%p209_p3), %v663_v2  ;;  %v264_v10 = vld [vmem:[%s762_s1] sm:$0xff] (!%p209_p3)  ;;  %v266_v12 = vld [vmem:[%s762_s1 + $0x10] sm:$0xff] (!%p209_p3)  ;;  %v267_v13 = vld [vmem:[%s762_s1 + $0x18] sm:$0xff] (!%p209_p3)  ;;  %vm418_vm2 = vcmask (!%p209_p3), 261120  }
   0x9   : > { %278 = vperm.xlu0 (!%p209_p3), %636, %v268_v1   ;;  %288 = vperm.xlu1 (!%p209_p3), %637, %v270_v3   ;;  %v272_v46 = vld [vmem:[%s764_s3] sm:$0xff] (!%p209_p3) }
   0xd   : > { %283 = vperm.xlu0 (!%p209_p3), %636, %v269_v4   ;;  %293 = vperm.xlu1 (!%p209_p3), %637, %v271_v5  }
   0xe   : > { %s772_s18 = smov (!%p245_p4, %s652_s18), 1 }
   0xf   : > { %s600_s26 = sshll.u32 %s772_s18, 2  ;;  %s601_s25 = sshll.u32 %s772_s18, 4 }
  0x10   : > { %s252_s8 = scalar_lea.vmem %s761_s0, %s600_s26  ;;  %s262_s28 = scalar_lea.vmem %s766_s5, %s601_s25 }
  0x11   : > { %v274_v6 = vld [vmem:[%s252_s8] sm:$0xf]  ;;  %415 = vperm.xlu0 %636, %v273_v8  }
  0x12   : > { %v275_v7 = vunpack.c.l.bf16 %v274_v6 }
  0x14   : > { %v297_v9 = vcombine.high %v275_v7, %v275_v7 }
  0x16   : > { %591 = vmatprep.subr.msk.mxu0 %vm311_vm0, %v297_v9 }
  0x17   : > { %592 = vmatpush1.msk.msra.mxu0 %vm311_vm0, %v275_v7 }
  0x18   : > { %593 = vmatmul.mubr.msk.f32.vlgmr.msra.gmra.mrb[0].mxu0 %vm298_vm1, %v264_v10 }
  0x19   : > { %386 = vmatprep.mubr.f32.mxu0 %v662_v0 }
  0x1c   : > { %594 = vmatmul.mubr.msk.f32.gmra.mrb[2].mxu0 %vm298_vm1, %v265_v11 }
  0x1d   : > { %392 = vmatprep.mubr.f32.mxu0 %v662_v0 }
  0x20   : > { %595 = vmatmul.mubr.msk.f32.gmra.mrb[4].mxu0 %vm298_vm1, %v266_v12 }
  0x21   : > { %398 = vmatprep.mubr.f32.mxu0 %v662_v0 }
  0x24   : > { %596 = vmatmul.mubr.msk.f32.gmra.mrb[6].mxu0 %vm298_vm1, %v267_v13 }
  0x88   : > { %v279_v14 = vpop.permute.xlu0 %278  ;;  %v289_v23 = vpop.permute.xlu1 %288 }
  0x8c   : > { %v284_v18 = vpop.permute.xlu0 %283  ;;  %v294_v34 = vpop.permute.xlu1 %293 }
  0x90   : > { %v416_v47 = vpop.permute.xlu0 %415 }
  0xeb   : > { %v382_v15 = vpop.f32.mrb[0].mxu0 }
  0xec   : > { %v384_v16 = vpop.f32.mrb[1].mxu0  ;;  %v383_v17 = vadd.f32 %v382_v15, %v279_v14 }
  0xed   : > { %v385_v19 = vadd.f32 %v384_v16, %v279_v14 }
  0xee   : > { %v405_v25 = vmax.f32 %v383_v17, 0.0 }
  0xef   : > { %v388_v20 = vpop.f32.mrb[2].mxu0  ;;  %v406_v27 = vmax.f32 %v385_v19, 0.0 }
  0xf0   : > { %v389_v21 = vadd.f32 %v388_v20, %v284_v18  ;;  %v390_v22 = vpop.f32.mrb[3].mxu0 }
  0xf1   : > { %v391_v24 = vadd.f32 %v390_v22, %v284_v18 }
  0xf2   : > { %v407_v26 = vmax.f32 %v389_v21, 0.0 }
  0xf3   : > { %v408_v28 = vmax.f32 %v391_v24, 0.0  ;;  %v394_v29 = vpop.f32.mrb[4].mxu0 }
  0xf4   : > { %v396_v30 = vpop.f32.mrb[5].mxu0  ;;  %v604_v31 = vpack.c.bf16 %v407_v26, %v405_v25  ;;  %v395_v33 = vadd.f32 %v394_v29, %v289_v23 }
  0xf5   : > { %v602_v32 = vpack.c.bf16 %v408_v28, %v406_v27  ;;  %v397_v35 = vadd.f32 %v396_v30, %v289_v23 }
  0xf6   : > { %v409_v40 = vmax.f32 %v395_v33, 0.0 }
  0xf7   : > { %v400_v36 = vpop.f32.mrb[6].mxu0  ;;  %603 = vmatprep.subr.bf16.mxu1 %v602_v32  ;;  %v410_v42 = vmax.f32 %v397_v35, 0.0 }
  0xf8   : > { %v401_v37 = vadd.f32 %v400_v36, %v294_v34  ;;  %v402_v38 = vpop.f32.mrb[7].mxu0  ;;  %605 = vmatpush1.bf16.msra.mxu1 %v604_v31 }
  0xf9   : > { %v403_v39 = vadd.f32 %v402_v38, %v294_v34 }
  0xfa   : > { %v411_v41 = vmax.f32 %v401_v37, 0.0 }
  0xfb   : > { %v412_v43 = vmax.f32 %v403_v39, 0.0 }
  0xfc   : > { %v608_v44 = vpack.c.bf16 %v411_v41, %v409_v40 }
  0xfd   : > { %v606_v45 = vpack.c.bf16 %v412_v43, %v410_v42 }
  0xff   : > { %607 = vmatprep.subr.bf16.mxu1 %v606_v45 }
 0x100   : > { %609 = vmatpush1.bf16.msra.mxu1 %v608_v44 }
 0x103   : > { %597 = vmatmul.mubr.msk.f32.vlgmr.msra.gmra.mrb[0].mxu1 %vm418_vm2, %v272_v46 }
 0x1d6   : > { %v488_v48 = vpop.f32.mrb[0].mxu1 }
 0x1d7   : > { %v489_v49 = vadd.f32 %v488_v48, %v416_v47  ;;  %v490_v50 = vpop.f32.mrb[1].mxu1 }
 0x1d8   : > { %v491_v51 = vadd.f32 %v490_v50, %v416_v47 }
 0x1d9   : > { %493 = vst [vmem:[%s262_s28] sm:$0xff] %v489_v49 }
 0x1da   : > { %494 = vst [vmem:[%s262_s28 + $0x8] sm:$0xff] %v491_v51 }
 0x1db PF: > { %s15_s20 = sadd.s32 1, %s660_s20   ;;  %s767_s18 = smov %s656_s19 }
 0x1dc   : > { %p12_p5 = scmp.ge.s32.totalorder %s15_s20, 4   ;;  %s768_s19 = smov %s770_s21 }
 0x1de   :  { %14 = sbr.rel (!%p12_p5) target bundleno = 2 (0x2), region = 70 }

</bundles_post_ra>
